<compile_context>
chip_gen: v5e
topology: v5e:2x2
jax: 0.10.0
libtpu: 0.0.40
codegen_flags: <defaults>
</compile_context>

<pallas_src>
import functools

import jax
import jax.numpy as jnp
from jax.experimental import pallas as pl
from jax.experimental.pallas import tpu as pltpu

C_IN = 128        # fixed by the module
C_EXT = 30        # hidden width of conv_ext
C_EXT_PAD = 32    # padded to a sublane multiple
C_FUSED = 64      # padded fused head-1 output rows (each head 8-aligned)
C_OUT = 16        # 3 scale + 9 rot + 3 trans + 1 exist output rows

# Row offsets of each head inside the fused (C_FUSED, 128) weight.  Every head
# starts on an 8-sublane boundary so the h[rows] slices are tile-aligned.
_R_SCALE = 0      # rows 0:3
_R_QUAT = 8       # rows 8:12
_R_TRANS = 16     # rows 16:19
_R_EXT = 24       # rows 24:54 (padded through 24:56)


def _para_pred_kernel(x_ref, w1_ref, b1_ref, w2_ref, b2_ref, out_ref):
    x = x_ref[0]                                          # (128, TILE_N)

    # ---- fused 1x1 convs: one (64,128) x (128,TILE_N) MXU matmul -----------
    h = jnp.dot(w1_ref[...], x, preferred_element_type=jnp.float32)
    h = h + b1_ref[...]                                   # (64, TILE_N), f32

    # ---- scale head: sigmoid ------------------------------------------------
    scale = jax.nn.sigmoid(h[_R_SCALE:_R_SCALE + 3, :])   # (3, T)

    # ---- rotate head: L2-normalize quat rows, then quat2mat ----------------
    quat = h[_R_QUAT:_R_QUAT + 4, :]                      # (4, T)
    sumsq = jnp.sum(quat * quat, axis=0, keepdims=True)   # (1, T)
    # == quat / max(norm, 1e-12)  (F.normalize clamp_min), via one rsqrt.
    quat = quat * jax.lax.rsqrt(jnp.maximum(sumsq, 1e-24))

    w = quat[0:1, :]
    qx = quat[1:2, :]
    qy = quat[2:3, :]
    qz = quat[3:4, :]
    w2, x2, y2, z2 = w * w, qx * qx, qy * qy, qz * qz
    wx, wy, wz = w * qx, w * qy, w * qz
    xy, xz, yz = qx * qy, qx * qz, qy * qz

    # ---- trans head: tanh ---------------------------------------------------
    trans = jnp.tanh(h[_R_TRANS:_R_TRANS + 3, :])         # (3, T)

    # ---- exist head: LeakyReLU(0.2) -> (1,32) x (32,TILE_N) ----------------
    he = h[_R_EXT:_R_EXT + C_EXT_PAD, :]                  # (32, T)
    he = jnp.where(he > 0, he, 0.2 * he)
    exist = jnp.dot(w2_ref[...], he, preferred_element_type=jnp.float32)
    exist = exist + b2_ref[...]                           # (1, T)

    # ---- single lane-dense store of all 16 output rows (XLU concat is free)
    out_ref[0] = jnp.concatenate(
        [scale,
         w2 + x2 - y2 - z2, 2 * xy - 2 * wz, 2 * wy + 2 * xz,
         2 * wz + 2 * xy, w2 - x2 + y2 - z2, 2 * yz - 2 * wx,
         2 * xz - 2 * wy, 2 * wx + 2 * yz, w2 - x2 - y2 + z2,
         trans,
         exist],
        axis=0)


@functools.partial(jax.jit, static_argnames=("tile_n", "use_bf16"))
def para_pred(x_cuboid, params, *, tile_n=8192, use_bf16=False):
    """x_cuboid: (B, 128, N) float32 (PyTorch NCL layout).
    Returns (scale (B,N,3), rotate (B,N,3,3), trans (B,N,3), exist (B,N,1))."""
    B, C, N = x_cuboid.shape
    assert C == C_IN
    (ws, bs, wr, br, wt, bt, we1, be1, we2, be2) = params

    # Pack the four heads into one fused, sublane-aligned weight/bias
    # (PyTorch orientation: weight (C_out, C_in)).
    w1 = jnp.zeros((C_FUSED, C_IN), jnp.float32)
    w1 = (w1.at[_R_SCALE:_R_SCALE + 3].set(ws)
            .at[_R_QUAT:_R_QUAT + 4].set(wr)
            .at[_R_TRANS:_R_TRANS + 3].set(wt)
            .at[_R_EXT:_R_EXT + C_EXT].set(we1))
    b1 = jnp.zeros((C_FUSED,), jnp.float32)
    b1 = (b1.at[_R_SCALE:_R_SCALE + 3].set(bs)
            .at[_R_QUAT:_R_QUAT + 4].set(br)
            .at[_R_TRANS:_R_TRANS + 3].set(bt)
            .at[_R_EXT:_R_EXT + C_EXT].set(be1))[:, None]        # (64, 1)
    w2 = jnp.zeros((1, C_EXT_PAD), jnp.float32).at[:, :C_EXT].set(
        we2.reshape(1, C_EXT))                                   # (1, 32)
    b2 = be2.reshape(1, 1)                                       # (1, 1)

    x_in = x_cuboid
    if use_bf16:
        # Halves the dominant HBM read; accumulation & nonlinearities stay f32.
        x_in = x_in.astype(jnp.bfloat16)
        w1 = w1.astype(jnp.bfloat16)

    # Tile the lane (N) axis; no padded copy of x.  Pallas handles the partial
    # trailing block (its tail columns are column-independent and discarded).
    n_ceil = ((max(N, 128) + 127) // 128) * 128
    tile = min(tile_n, n_ceil)
    if B == 1 and n_ceil >= 2 * 128:
        # Keep >= 2 grid points so v7x can shard across its two TensorCores.
        tile = min(tile, max(128, (n_ceil // 2) // 128 * 128))
    n_tiles = pl.cdiv(N, tile)

    # Raise the scoped-VMEM limit only when the double-buffered working set
    # would exceed the 16 MiB v5e default (e.g. tile_n=16384 on v6e/v7x).
    itemsize = 2 if use_bf16 else 4
    vmem_need = 2 * C_IN * tile * itemsize + 2 * C_OUT * tile * 4 + (1 << 20)
    ck = dict(dimension_semantics=("parallel", "parallel"))
    if vmem_need > (14 << 20):
        ck["vmem_limit_bytes"] = min(vmem_need + (8 << 20), 48 << 20)

    out = pl.pallas_call(
        _para_pred_kernel,
        out_shape=jax.ShapeDtypeStruct((B, C_OUT, N), jnp.float32),
        grid_spec=pltpu.PrefetchScalarGridSpec(
            num_scalar_prefetch=0,
            grid=(B, n_tiles),
            in_specs=[
                pl.BlockSpec((1, C_IN, tile), lambda b, n: (b, 0, n)),   # x
                pl.BlockSpec((C_FUSED, C_IN), lambda b, n: (0, 0)),      # fused W
                pl.BlockSpec((C_FUSED, 1), lambda b, n: (0, 0)),         # fused b
                pl.BlockSpec((1, C_EXT_PAD), lambda b, n: (0, 0)),       # ext2 W
                pl.BlockSpec((1, 1), lambda b, n: (0, 0)),               # ext2 b
            ],
            out_specs=pl.BlockSpec((1, C_OUT, tile), lambda b, n: (b, 0, n)),
        ),
        compiler_params=pltpu.CompilerParams(**ck),
    )(x_in, w1, b1, w2, b2)

    # ONE transpose of the lane-dense slab, then cheap last-dim slices back to
    # the documented PyTorch output contract.
    out_t = jnp.transpose(out, (0, 2, 1))                 # (B, N, 16)
    scale = out_t[..., 0:3]
    rotate = out_t[..., 3:12].reshape(B, N, 3, 3)
    trans = out_t[..., 12:15]
    exist = out_t[..., 15:16]
    return scale, rotate, trans, exist


def init_params(key):
    """Deterministic synthetic parameters in PyTorch orientation:
    weights (C_out, C_in) == Conv1d.weight[:, :, 0], biases (C_out,)."""
    ks = jax.random.split(key, 6)
    ws = 0.02 * jax.random.normal(ks[0], (3, C_IN), jnp.float32)
    bs = jnp.zeros((3,), jnp.float32)                       # zero-init bias
    wr = 0.02 * jax.random.normal(ks[1], (4, C_IN), jnp.float32)
    br = jnp.array([1.0, 0.0, 0.0, 0.0], jnp.float32)       # identity quat bias
    wt = 0.02 * jax.random.normal(ks[2], (3, C_IN), jnp.float32)
    bt = jnp.zeros((3,), jnp.float32)                       # zero-init bias
    we1 = 0.02 * jax.random.normal(ks[3], (C_EXT, C_IN), jnp.float32)
    be1 = 0.02 * jax.random.normal(ks[4], (C_EXT,), jnp.float32)
    we2 = 0.02 * jax.random.normal(ks[5], (1, C_EXT), jnp.float32)
    be2 = jnp.zeros((1,), jnp.float32)
    return (ws, bs, wr, br, wt, bt, we1, be1, we2, be2)


def para_pred_ref(x_cuboid, params):
    """Pure-JAX reference (mirrors the PyTorch forward) for correctness."""
    (ws, bs, wr, br, wt, bt, we1, be1, we2, be2) = params
    x = jnp.transpose(x_cuboid, (0, 2, 1))                  # (B, N, 128)
    scale = jax.nn.sigmoid(x @ ws.T + bs)
    quat = x @ wr.T + br
    quat = quat / jnp.maximum(
        jnp.linalg.norm(quat, axis=-1, keepdims=True), 1e-12)
    w, qx, qy, qz = quat[..., 0], quat[..., 1], quat[..., 2], quat[..., 3]
    w2, x2, y2, z2 = w * w, qx * qx, qy * qy, qz * qz
    wx, wy, wz = w * qx, w * qy, w * qz
    xy, xz, yz = qx * qy, qx * qz, qy * qz
    rot = jnp.stack(
        [w2 + x2 - y2 - z2, 2 * xy - 2 * wz, 2 * wy + 2 * xz,
         2 * wz + 2 * xy, w2 - x2 + y2 - z2, 2 * yz - 2 * wx,
         2 * xz - 2 * wy, 2 * wx + 2 * yz, w2 - x2 - y2 + z2],
        axis=-1).reshape(*quat.shape[:-1], 3, 3)
    trans = jnp.tanh(x @ wt.T + bt)
    h = x @ we1.T + be1
    h = jnp.where(h > 0, h, 0.2 * h)
    exist = h @ we2.T + be2
    return scale, rot, trans, exist


if __name__ == "__main__":
    key = jax.random.PRNGKey(0)
    k_x, k_x2, k_p = jax.random.split(key, 3)
    params = init_params(k_p)

    # Case 1: B=2, N not a multiple of 128 (exercises the partial last block,
    # no wrapper-side padding copy of x).
    B, N = 2, 200
    x_cuboid = jax.random.normal(k_x, (B, C_IN, N), jnp.float32)  # PyTorch NCL
    outs = jax.block_until_ready(para_pred(x_cuboid, params))
    refs = para_pred_ref(x_cuboid, params)
    for o, r in zip(outs, refs):
        assert o.shape == r.shape, (o.shape, r.shape)
        assert jnp.allclose(o, r, atol=1e-4, rtol=1e-4), float(
            jnp.max(jnp.abs(o - r)))

    # Case 2: B=1 (exercises the tile split that keeps >=2 grid points for
    # v7x's two TensorCores) with another non-aligned N.
    B2, N2 = 1, 300
    x2 = jax.random.normal(k_x2, (B2, C_IN, N2), jnp.float32)
    outs2 = jax.block_until_ready(para_pred(x2, params))
    refs2 = para_pred_ref(x2, params)
    for o, r in zip(outs2, refs2):
        assert o.shape == r.shape, (o.shape, r.shape)
        assert jnp.allclose(o, r, atol=1e-4, rtol=1e-4), float(
            jnp.max(jnp.abs(o - r)))

    print("KERNEL_OK")
</pallas_src>

<mosaic_0001>
module attributes {stable_mosaic.version = 11 : i64} {
  func.func @_para_pred_kernel(%arg0: i32, %arg1: i32, %arg2: memref<1x128x256xf32, #tpu.memory_space<vmem>>, %arg3: memref<64x128xf32, #tpu.memory_space<vmem>>, %arg4: memref<64x1xf32, #tpu.memory_space<vmem>>, %arg5: memref<1x32xf32, #tpu.memory_space<vmem>>, %arg6: memref<1x1xf32, #tpu.memory_space<vmem>>, %arg7: memref<1x16x256xf32, #tpu.memory_space<vmem>>) attributes {dimension_semantics = [#tpu.dimension_semantics<parallel>, #tpu.dimension_semantics<parallel>], iteration_bounds = array<i64: 2, 1>, scalar_prefetch = 0 : i64, scratch_operands = 0 : i64, tpu.core_type = #tpu.core_type<tc>, window_params = [{transform_indices = @transform_0, window_bounds = array<i64: 1, 128, 256>}, {pipeline_mode = #tpu.pipeline_mode<synchronous>, transform_indices = @transform_1, window_bounds = array<i64: 64, 128>}, {pipeline_mode = #tpu.pipeline_mode<synchronous>, transform_indices = @transform_2, window_bounds = array<i64: 64, 1>}, {pipeline_mode = #tpu.pipeline_mode<synchronous>, transform_indices = @transform_3, window_bounds = array<i64: 1, 32>}, {pipeline_mode = #tpu.pipeline_mode<synchronous>, transform_indices = @transform_4, window_bounds = array<i64: 1, 1>}, {transform_indices = @transform_5, window_bounds = array<i64: 1, 16, 256>}]} {
    %c0 = arith.constant 0 : index
    %c0_0 = arith.constant 0 : index
    %c0_1 = arith.constant 0 : index
    %0 = vector.load %arg2[%c0, %c0_0, %c0_1] : memref<1x128x256xf32, #tpu.memory_space<vmem>>, vector<1x128x256xf32>
    %1 = vector.shape_cast %0 : vector<1x128x256xf32> to vector<128x256xf32>
    %c0_2 = arith.constant 0 : index
    %c0_3 = arith.constant 0 : index
    %2 = vector.load %arg3[%c0_2, %c0_3] : memref<64x128xf32, #tpu.memory_space<vmem>>, vector<64x128xf32>
    %cst = arith.constant dense<0.000000e+00> : vector<64x256xf32>
    %3 = tpu.matmul %2, %1, %cst {dimension_numbers = #tpu.dot_dimension_numbers<[1], [0], [0], [1], [0, 0, 1, 1], [], []>} : vector<64x128xf32>, vector<128x256xf32>, vector<64x256xf32> -> vector<64x256xf32>
    %c0_4 = arith.constant 0 : index
    %c0_5 = arith.constant 0 : index
    %4 = vector.load %arg4[%c0_4, %c0_5] : memref<64x1xf32, #tpu.memory_space<vmem>>, vector<64x1xf32>
    %5 = vector.broadcast %4 : vector<64x1xf32> to vector<64x256xf32>
    %6 = arith.addf %3, %5 : vector<64x256xf32>
    %7 = vector.extract_strided_slice %6 {offsets = [0, 0], sizes = [3, 256], strides = [1, 1]} : vector<64x256xf32> to vector<3x256xf32>
    %8 = arith.negf %7 : vector<3x256xf32>
    %9 = math.exp %8 : vector<3x256xf32>
    %cst_6 = arith.constant 1.000000e+00 : f32
    %10 = vector.broadcast %cst_6 : f32 to vector<3x256xf32>
    %11 = arith.addf %10, %9 : vector<3x256xf32>
    %12 = arith.divf %10, %11 : vector<3x256xf32>
    %13 = vector.extract_strided_slice %6 {offsets = [8, 0], sizes = [4, 256], strides = [1, 1]} : vector<64x256xf32> to vector<4x256xf32>
    %14 = arith.mulf %13, %13 : vector<4x256xf32>
    %cst_7 = arith.constant dense<0.000000e+00> : vector<256xf32>
    %15 = vector.multi_reduction <add>, %14, %cst_7 [0] : vector<4x256xf32> to vector<256xf32>
    %16 = vector.shape_cast %15 : vector<256xf32> to vector<1x256xf32>
    %cst_8 = arith.constant 1.000000e-24 : f32
    %17 = vector.broadcast %cst_8 : f32 to vector<1x256xf32>
    %18 = arith.maximumf %16, %17 : vector<1x256xf32>
    %19 = math.rsqrt %18 : vector<1x256xf32>
    %20 = vector.broadcast %19 : vector<1x256xf32> to vector<4x256xf32>
    %21 = arith.mulf %13, %20 : vector<4x256xf32>
    %22 = vector.extract_strided_slice %21 {offsets = [0, 0], sizes = [1, 256], strides = [1, 1]} : vector<4x256xf32> to vector<1x256xf32>
    %23 = vector.extract_strided_slice %21 {offsets = [1, 0], sizes = [1, 256], strides = [1, 1]} : vector<4x256xf32> to vector<1x256xf32>
    %24 = vector.extract_strided_slice %21 {offsets = [2, 0], sizes = [1, 256], strides = [1, 1]} : vector<4x256xf32> to vector<1x256xf32>
    %25 = vector.extract_strided_slice %21 {offsets = [3, 0], sizes = [1, 256], strides = [1, 1]} : vector<4x256xf32> to vector<1x256xf32>
    %26 = arith.mulf %22, %22 : vector<1x256xf32>
    %27 = arith.mulf %23, %23 : vector<1x256xf32>
    %28 = arith.mulf %24, %24 : vector<1x256xf32>
    %29 = arith.mulf %25, %25 : vector<1x256xf32>
    %30 = arith.mulf %22, %23 : vector<1x256xf32>
    %31 = arith.mulf %22, %24 : vector<1x256xf32>
    %32 = arith.mulf %22, %25 : vector<1x256xf32>
    %33 = arith.mulf %23, %24 : vector<1x256xf32>
    %34 = arith.mulf %23, %25 : vector<1x256xf32>
    %35 = arith.mulf %24, %25 : vector<1x256xf32>
    %36 = vector.extract_strided_slice %6 {offsets = [16, 0], sizes = [3, 256], strides = [1, 1]} : vector<64x256xf32> to vector<3x256xf32>
    %37 = math.tanh %36 : vector<3x256xf32>
    %38 = vector.extract_strided_slice %6 {offsets = [24, 0], sizes = [32, 256], strides = [1, 1]} : vector<64x256xf32> to vector<32x256xf32>
    %cst_9 = arith.constant 0.000000e+00 : f32
    %39 = vector.broadcast %cst_9 : f32 to vector<32x256xf32>
    %40 = arith.cmpf ogt, %38, %39 : vector<32x256xf32>
    %cst_10 = arith.constant 2.000000e-01 : f32
    %41 = vector.broadcast %cst_10 : f32 to vector<32x256xf32>
    %42 = arith.mulf %41, %38 : vector<32x256xf32>
    %43 = arith.select %40, %38, %42 : vector<32x256xi1>, vector<32x256xf32>
    %c0_11 = arith.constant 0 : index
    %c0_12 = arith.constant 0 : index
    %44 = vector.load %arg5[%c0_11, %c0_12] : memref<1x32xf32, #tpu.memory_space<vmem>>, vector<1x32xf32>
    %cst_13 = arith.constant dense<0.000000e+00> : vector<1x256xf32>
    %45 = tpu.matmul %44, %43, %cst_13 {dimension_numbers = #tpu.dot_dimension_numbers<[1], [0], [0], [1], [0, 0, 1, 1], [], []>} : vector<1x32xf32>, vector<32x256xf32>, vector<1x256xf32> -> vector<1x256xf32>
    %c0_14 = arith.constant 0 : index
    %c0_15 = arith.constant 0 : index
    %46 = vector.load %arg6[%c0_14, %c0_15] : memref<1x1xf32, #tpu.memory_space<vmem>>, vector<1x1xf32>
    %47 = vector.broadcast %46 : vector<1x1xf32> to vector<1x256xf32>
    %48 = arith.addf %45, %47 : vector<1x256xf32>
    %49 = arith.addf %26, %27 : vector<1x256xf32>
    %50 = arith.subf %49, %28 : vector<1x256xf32>
    %51 = arith.subf %50, %29 : vector<1x256xf32>
    %cst_16 = arith.constant 2.000000e+00 : f32
    %52 = vector.broadcast %cst_16 : f32 to vector<1x256xf32>
    %53 = arith.mulf %52, %33 : vector<1x256xf32>
    %cst_17 = arith.constant 2.000000e+00 : f32
    %54 = vector.broadcast %cst_17 : f32 to vector<1x256xf32>
    %55 = arith.mulf %54, %32 : vector<1x256xf32>
    %56 = arith.subf %53, %55 : vector<1x256xf32>
    %cst_18 = arith.constant 2.000000e+00 : f32
    %57 = vector.broadcast %cst_18 : f32 to vector<1x256xf32>
    %58 = arith.mulf %57, %31 : vector<1x256xf32>
    %cst_19 = arith.constant 2.000000e+00 : f32
    %59 = vector.broadcast %cst_19 : f32 to vector<1x256xf32>
    %60 = arith.mulf %59, %34 : vector<1x256xf32>
    %61 = arith.addf %58, %60 : vector<1x256xf32>
    %cst_20 = arith.constant 2.000000e+00 : f32
    %62 = vector.broadcast %cst_20 : f32 to vector<1x256xf32>
    %63 = arith.mulf %62, %32 : vector<1x256xf32>
    %cst_21 = arith.constant 2.000000e+00 : f32
    %64 = vector.broadcast %cst_21 : f32 to vector<1x256xf32>
    %65 = arith.mulf %64, %33 : vector<1x256xf32>
    %66 = arith.addf %63, %65 : vector<1x256xf32>
    %67 = arith.subf %26, %27 : vector<1x256xf32>
    %68 = arith.addf %67, %28 : vector<1x256xf32>
    %69 = arith.subf %68, %29 : vector<1x256xf32>
    %cst_22 = arith.constant 2.000000e+00 : f32
    %70 = vector.broadcast %cst_22 : f32 to vector<1x256xf32>
    %71 = arith.mulf %70, %35 : vector<1x256xf32>
    %cst_23 = arith.constant 2.000000e+00 : f32
    %72 = vector.broadcast %cst_23 : f32 to vector<1x256xf32>
    %73 = arith.mulf %72, %30 : vector<1x256xf32>
    %74 = arith.subf %71, %73 : vector<1x256xf32>
    %cst_24 = arith.constant 2.000000e+00 : f32
    %75 = vector.broadcast %cst_24 : f32 to vector<1x256xf32>
    %76 = arith.mulf %75, %34 : vector<1x256xf32>
    %cst_25 = arith.constant 2.000000e+00 : f32
    %77 = vector.broadcast %cst_25 : f32 to vector<1x256xf32>
    %78 = arith.mulf %77, %31 : vector<1x256xf32>
    %79 = arith.subf %76, %78 : vector<1x256xf32>
    %cst_26 = arith.constant 2.000000e+00 : f32
    %80 = vector.broadcast %cst_26 : f32 to vector<1x256xf32>
    %81 = arith.mulf %80, %30 : vector<1x256xf32>
    %cst_27 = arith.constant 2.000000e+00 : f32
    %82 = vector.broadcast %cst_27 : f32 to vector<1x256xf32>
    %83 = arith.mulf %82, %35 : vector<1x256xf32>
    %84 = arith.addf %81, %83 : vector<1x256xf32>
    %85 = arith.subf %26, %27 : vector<1x256xf32>
    %86 = arith.subf %85, %28 : vector<1x256xf32>
    %87 = arith.addf %86, %29 : vector<1x256xf32>
    %88 = tpu.concatenate %12, %51, %56, %61, %66, %69, %74, %79, %84, %87, %37, %48 in 0 : vector<3x256xf32>, vector<1x256xf32>, vector<1x256xf32>, vector<1x256xf32>, vector<1x256xf32>, vector<1x256xf32>, vector<1x256xf32>, vector<1x256xf32>, vector<1x256xf32>, vector<1x256xf32>, vector<3x256xf32>, vector<1x256xf32> -> vector<16x256xf32>
    %c0_28 = arith.constant 0 : index
    %c0_29 = arith.constant 0 : index
    %c0_30 = arith.constant 0 : index
    %89 = vector.load %arg7[%c0_28, %c0_29, %c0_30] : memref<1x16x256xf32, #tpu.memory_space<vmem>>, vector<1x16x256xf32>
    %90 = vector.shape_cast %89 : vector<1x16x256xf32> to vector<16x256xf32>
    %91 = vector.shape_cast %88 : vector<16x256xf32> to vector<1x16x256xf32>
    tpu.vector_store %arg7[%c0_28, %c0_29, %c0_30], %91 {strides = array<i32>} : memref<1x16x256xf32, #tpu.memory_space<vmem>>, vector<1x16x256xf32>,
    return
  }
  func.func @transform_0(%arg0: i32, %arg1: i32) -> (i32, i32, i32) {
    %c0_i32 = arith.constant 0 : i32
    %c0_i32_0 = arith.constant 0 : i32
    return %arg0, %c0_i32, %arg1 : i32, i32, i32
  }
  func.func @transform_1(%arg0: i32, %arg1: i32) -> (i32, i32) {
    %c0_i32 = arith.constant 0 : i32
    %c0_i32_0 = arith.constant 0 : i32
    %c0_i32_1 = arith.constant 0 : i32
    return %c0_i32, %c0_i32_0 : i32, i32
  }
  func.func @transform_2(%arg0: i32, %arg1: i32) -> (i32, i32) {
    %c0_i32 = arith.constant 0 : i32
    %c0_i32_0 = arith.constant 0 : i32
    %c0_i32_1 = arith.constant 0 : i32
    return %c0_i32, %c0_i32_0 : i32, i32
  }
  func.func @transform_3(%arg0: i32, %arg1: i32) -> (i32, i32) {
    %c0_i32 = arith.constant 0 : i32
    %c0_i32_0 = arith.constant 0 : i32
    %c0_i32_1 = arith.constant 0 : i32
    return %c0_i32, %c0_i32_0 : i32, i32
  }
  func.func @transform_4(%arg0: i32, %arg1: i32) -> (i32, i32) {
    %c0_i32 = arith.constant 0 : i32
    %c0_i32_0 = arith.constant 0 : i32
    %c0_i32_1 = arith.constant 0 : i32
    return %c0_i32, %c0_i32_0 : i32, i32
  }
  func.func @transform_5(%arg0: i32, %arg1: i32) -> (i32, i32, i32) {
    %c0_i32 = arith.constant 0 : i32
    %c0_i32_0 = arith.constant 0 : i32
    return %arg0, %c0_i32, %arg1 : i32, i32, i32
  }
}

</mosaic_0001>

<bundles_post_ra>
// kernel: para_pred.1
= control target key start
LH: loop header
LB: loop body
LE: loop exit
PB: predicated region body
PF: predicated region fallthrough
CT: control target
= control target key end

     0   :  { %s1018_s20 = smov 0   ;;  %s1020_s21 = smov 0   ;;  %s1312_s0 = inlined_call_operand.vmem [shape: f32[2,128,200], index: 0, kind: input, shape index: {}]   ;;  %s1313_s1 = inlined_call_operand.vmem [shape: f32[64,128], index: 1, kind: input, shape index: {}]   ;;  %s1314_s2 = inlined_call_operand.vmem [shape: f32[64,1], index: 2, kind: input, shape index: {}]   ;;  %s1315_s3 = inlined_call_operand.vmem [shape: f32[1,32], index: 3, kind: input, shape index: {}]   ;;  %s1316_s4 = inlined_call_operand.<no memory space> [shape: f32[1,1], index: 4, kind: input, shape index: {}]   ;;  %s1317_s5 = inlined_call_operand.vmem [shape: f32[2,16,200], index: 5, kind: output, shape index: {}]  }
   0x1   :  { %v10_v0 = vstv %s1316_s4  ;;  %s1022_s22 = smov 0  }
   0x2   :  { %11 = vst [vmem:[#allocation2] sm:$0x1] %v10_v0 }
   0x3 LB: > { %s29_s4 = sadd.s32 1, %s978_s21  ;;  %p871_p0 = scmp.ge.s32.totalorder %s982_s22, 1  ;;  %s982_s22 = sphi %s1022_s22, %s17_s22   ;;  %s978_s21 = sphi %s1020_s21, %s1327_s21   ;;  %s974_s20 = sphi %s1018_s20, %s1326_s20  }
   0x4   : > { %p31_p1 = scmp.ge.s32.totalorder %s29_s4, 2  ;;  %p210_p2 = scmp.lt.s32.totalorder %s982_s22, 3 }
   0x6   : > { %s1329_s4 = smov (%p31_p1, %s29_s4), 0  ;;  %p211_p3 = pnand %p871_p0, %p210_p2 }
   0x7   : > { %p247_p4 = scmp.lt.s32.totalorder (!%p211_p3), %s974_s20, 1 }
   0x8   : > { %214 = sbr.rel (%p211_p3) target bundleno = 353 (0x161), region = 40 }
   0xd   : > { %s1331_s20 = smov (!%p247_p4, %s974_s20), 1  ;;  %v298_v33 = vld [vmem:[%s1313_s1] sm:$0xff]  ;;  %v303_v35 = vld [vmem:[%s1313_s1 + $0x28] sm:$0xff]  ;;  %v312_v36 = vld [vmem:[%s1314_s2 + $0x30] sm:$0xff]  ;;  %v984_v38 = vmov 0   ;;  %vm473_vm0 = vcmask 1043456  }
   0xe   : > { %s882_s23 = sshll.u32 %s1331_s20, 8  ;;  %v302_v34 = vld [vmem:[%s1313_s1 + $0x20] sm:$0xff]  ;;  %942 = vset.pattern.permute.xlu1 %v984_v38  ;;  %941 = vset.pattern.permute.xlu0 %v984_v38  ;;  %v307_v39 = vld [vmem:[%s1314_s2 + $0x8] sm:$0xff]  ;;  %v304_v41 = vld [vmem:[%s1313_s1 + $0x30] sm:$0xff]  ;;  %vm568_vm7 = vcmask 261120   ;;  %s883_s12 = sshll.u32 %s1331_s20, 5 }
   0xf   : > { %s1042_s26 = scalar_lea.vmem %s1312_s0, %s882_s23  ;;  %v310_v37 = vld [vmem:[%s1314_s2 + $0x20] sm:$0xff]  ;;  %346 = vperm.xlu0 %941, %v312_v36   ;;  %v299_v40 = vld [vmem:[%s1313_s1 + $0x8] sm:$0xff]  ;;  %943 = vset.pattern.permute.xlu2 %v984_v38  ;;  %v309_v43 = vld [vmem:[%s1314_s2 + $0x18] sm:$0xff]  ;;  %s264_s15 = scalar_lea.vmem %s1317_s5, %s883_s12 }
  0x10   : > { %v296_v1 = vld [vmem:[%s1042_s26 + $0xf0] sm:$0xff]  ;;  %v297_v2 = vld [vmem:[%s1042_s26 + $0xf8] sm:$0xff]  ;;  %v294_v3 = vld [vmem:[%s1042_s26 + $0xe0] sm:$0xff]  ;;  %336 = vperm.xlu1 %942, %v310_v37   ;;  %321 = vperm.xlu2 %943, %v307_v39  }
  0x11   : > { %353 = vmatpush.msra.mxu0 %v296_v1  ;;  %884 = vmatpush.msra.mxu2 %v296_v1  ;;  %v295_v4 = vld [vmem:[%s1042_s26 + $0xe8] sm:$0xff]  ;;  %v292_v5 = vld [vmem:[%s1042_s26 + $0xd0] sm:$0xff]  ;;  %v293_v6 = vld [vmem:[%s1042_s26 + $0xd8] sm:$0xff] }
  0x12   : > { %393 = vmatpush.msra.mxu1 %v297_v2  ;;  %900 = vmatpush.msra.mxu3 %v297_v2  ;;  %v290_v7 = vld [vmem:[%s1042_s26 + $0xc0] sm:$0xff]  ;;  %v291_v8 = vld [vmem:[%s1042_s26 + $0xc8] sm:$0xff]  ;;  %v288_v9 = vld [vmem:[%s1042_s26 + $0xb0] sm:$0xff] }
  0x13   : > { %354 = vmatpush.msra.mxu0 %v294_v3  ;;  %885 = vmatpush.msra.mxu2 %v294_v3  ;;  %v289_v10 = vld [vmem:[%s1042_s26 + $0xb8] sm:$0xff]  ;;  %v286_v11 = vld [vmem:[%s1042_s26 + $0xa0] sm:$0xff]  ;;  %v287_v12 = vld [vmem:[%s1042_s26 + $0xa8] sm:$0xff] }
  0x14   : > { %394 = vmatpush.msra.mxu1 %v295_v4  ;;  %901 = vmatpush.msra.mxu3 %v295_v4  ;;  %v284_v13 = vld [vmem:[%s1042_s26 + $0x90] sm:$0xff]  ;;  %v285_v14 = vld [vmem:[%s1042_s26 + $0x98] sm:$0xff]  ;;  %v282_v15 = vld [vmem:[%s1042_s26 + $0x80] sm:$0xff] }
  0x15   : > { %355 = vmatpush.msra.mxu0 %v292_v5  ;;  %886 = vmatpush.msra.mxu2 %v292_v5  ;;  %v283_v16 = vld [vmem:[%s1042_s26 + $0x88] sm:$0xff]  ;;  %v280_v17 = vld [vmem:[%s1042_s26 + $0x70] sm:$0xff]  ;;  %v281_v18 = vld [vmem:[%s1042_s26 + $0x78] sm:$0xff] }
  0x16   : > { %395 = vmatpush.msra.mxu1 %v293_v6  ;;  %902 = vmatpush.msra.mxu3 %v293_v6  ;;  %v278_v19 = vld [vmem:[%s1042_s26 + $0x60] sm:$0xff]  ;;  %v279_v20 = vld [vmem:[%s1042_s26 + $0x68] sm:$0xff]  ;;  %v276_v21 = vld [vmem:[%s1042_s26 + $0x50] sm:$0xff] }
  0x17   : > { %356 = vmatpush.msra.mxu0 %v290_v7  ;;  %887 = vmatpush.msra.mxu2 %v290_v7  ;;  %v277_v22 = vld [vmem:[%s1042_s26 + $0x58] sm:$0xff]  ;;  %v274_v23 = vld [vmem:[%s1042_s26 + $0x40] sm:$0xff]  ;;  %v275_v24 = vld [vmem:[%s1042_s26 + $0x48] sm:$0xff] }
  0x18   : > { %396 = vmatpush.msra.mxu1 %v291_v8  ;;  %903 = vmatpush.msra.mxu3 %v291_v8  ;;  %v272_v25 = vld [vmem:[%s1042_s26 + $0x30] sm:$0xff]  ;;  %v273_v26 = vld [vmem:[%s1042_s26 + $0x38] sm:$0xff]  ;;  %v270_v27 = vld [vmem:[%s1042_s26 + $0x20] sm:$0xff] }
  0x19   : > { %357 = vmatpush.msra.mxu0 %v288_v9  ;;  %888 = vmatpush.msra.mxu2 %v288_v9  ;;  %v271_v28 = vld [vmem:[%s1042_s26 + $0x28] sm:$0xff]  ;;  %v268_v29 = vld [vmem:[%s1042_s26 + $0x10] sm:$0xff]  ;;  %v269_v30 = vld [vmem:[%s1042_s26 + $0x18] sm:$0xff] }
  0x1a   : > { %397 = vmatpush.msra.mxu1 %v289_v10  ;;  %904 = vmatpush.msra.mxu3 %v289_v10  ;;  %v266_v31 = vld [vmem:[%s1042_s26] sm:$0xff]  ;;  %v267_v32 = vld [vmem:[%s1042_s26 + $0x8] sm:$0xff]  ;;  %v300_v45 = vld [vmem:[%s1313_s1 + $0x10] sm:$0xff] }
  0x1b   : > { %358 = vmatpush.msra.mxu0 %v286_v11  ;;  %889 = vmatpush.msra.mxu2 %v286_v11  ;;  %v311_v42 = vld [vmem:[%s1314_s2 + $0x28] sm:$0xff]  ;;  %v306_v44 = vld [vmem:[%s1314_s2] sm:$0xff]  ;;  %v308_v46 = vld [vmem:[%s1314_s2 + $0x10] sm:$0xff] }
  0x1c   : > { %398 = vmatpush.msra.mxu1 %v287_v12  ;;  %905 = vmatpush.msra.mxu3 %v287_v12  ;;  %v561_v47 = vld [vmem:[#allocation2] sm:$0x1]  ;;  %v301_v48 = vld [vmem:[%s1313_s1 + $0x18] sm:$0xff] }
  0x1d   : > { %359 = vmatpush.msra.mxu0 %v284_v13  ;;  %890 = vmatpush.msra.mxu2 %v284_v13  ;;  %v305_v53 = vld [vmem:[%s1313_s1 + $0x38] sm:$0xff] }
  0x1e   : > { %399 = vmatpush.msra.mxu1 %v285_v14  ;;  %906 = vmatpush.msra.mxu3 %v285_v14 }
  0x1f   : > { %360 = vmatpush.msra.mxu0 %v282_v15  ;;  %891 = vmatpush.msra.mxu2 %v282_v15 }
  0x20   : > { %400 = vmatpush.msra.mxu1 %v283_v16  ;;  %907 = vmatpush.msra.mxu3 %v283_v16 }
  0x21   : > { %361 = vmatpush.msra.mxu0 %v280_v17  ;;  %892 = vmatpush.msra.mxu2 %v280_v17 }
  0x22   : > { %401 = vmatpush.msra.mxu1 %v281_v18  ;;  %908 = vmatpush.msra.mxu3 %v281_v18 }
  0x23   : > { %362 = vmatpush.msra.mxu0 %v278_v19  ;;  %893 = vmatpush.msra.mxu2 %v278_v19 }
  0x24   : > { %402 = vmatpush.msra.mxu1 %v279_v20  ;;  %909 = vmatpush.msra.mxu3 %v279_v20 }
  0x25   : > { %363 = vmatpush.msra.mxu0 %v276_v21  ;;  %894 = vmatpush.msra.mxu2 %v276_v21 }
  0x26   : > { %403 = vmatpush.msra.mxu1 %v277_v22  ;;  %910 = vmatpush.msra.mxu3 %v277_v22 }
  0x27   : > { %364 = vmatpush.msra.mxu0 %v274_v23  ;;  %895 = vmatpush.msra.mxu2 %v274_v23 }
  0x28   : > { %404 = vmatpush.msra.mxu1 %v275_v24  ;;  %911 = vmatpush.msra.mxu3 %v275_v24 }
  0x29   : > { %365 = vmatpush.msra.mxu0 %v272_v25  ;;  %896 = vmatpush.msra.mxu2 %v272_v25 }
  0x2a   : > { %405 = vmatpush.msra.mxu1 %v273_v26  ;;  %912 = vmatpush.msra.mxu3 %v273_v26 }
  0x2b   : > { %366 = vmatpush.msra.mxu0 %v270_v27  ;;  %897 = vmatpush.msra.mxu2 %v270_v27 }
  0x2c   : > { %406 = vmatpush.msra.mxu1 %v271_v28  ;;  %913 = vmatpush.msra.mxu3 %v271_v28 }
  0x2d   : > { %367 = vmatpush.msra.mxu0 %v268_v29  ;;  %898 = vmatpush.msra.mxu2 %v268_v29 }
  0x2e   : > { %407 = vmatpush.msra.mxu1 %v269_v30  ;;  %914 = vmatpush.msra.mxu3 %v269_v30 }
  0x2f   : > { %368 = vmatpush.msra.mxu0 %v266_v31  ;;  %899 = vmatpush.msra.mxu2 %v266_v31 }
  0x30   : > { %408 = vmatpush.msra.mxu1 %v267_v32  ;;  %369 = vmatmul.f32.vlgmr.msra.gmra.mxu0 %v298_v33 }
  0x31   : > { %381 = vmatmul.f32.vlgmr.msra.gmra.mxu2 %v302_v34  ;;  %409 = vmatmul.f32.vlgmr.msra.gmra.mxu1 %v298_v33 }
  0x32   : > { %915 = vmatpush.msra.mxu3 %v267_v32  ;;  %341 = vperm.xlu0 %941, %v311_v42  }
  0x33   : > { %424 = vmatmul.f32.vlgmr.msra.gmra.mxu3 %v303_v35  ;;  %331 = vperm.xlu1 %942, %v309_v43  }
  0x34   : > { %316 = vperm.xlu2 %943, %v306_v44  }
  0x38   : > { %372 = vmatmul.f32.gmra.mxu0 %v299_v40 }
  0x39   : > { %384 = vmatmul.f32.gmra.mxu2 %v303_v35  ;;  %412 = vmatmul.f32.gmra.mxu1 %v299_v40 }
  0x3a   : > { %326 = vperm.xlu0 %941, %v308_v46  }
  0x3b   : > { %427 = vmatmul.f32.gmra.mxu3 %v304_v41  ;;  %564 = vperm.xlu1 %942, %v561_v47  }
  0x40   : > { %375 = vmatmul.f32.gmra.mxu0 %v300_v45 }
  0x41   : > { %387 = vmatmul.f32.gmra.mxu2 %v304_v41  ;;  %415 = vmatmul.f32.gmra.mxu1 %v300_v45 }
  0x43   : > { %430 = vmatmul.f32.gmra.mxu3 %v305_v53 }
  0x48   : > { %378 = vmatmul.f32.gmra.mxu0 %v301_v48 }
  0x49   : > { %418 = vmatmul.f32.gmra.mxu1 %v301_v48  ;;  %390 = vmatmul.f32.gmra.mxu2 %v305_v53 }
  0x51   : > { %421 = vmatmul.f32.gmra.mxu1 %v302_v34 }
  0x6a   : > { %v322_v49 = vpop.permute.xlu2 %321 }
  0x81   : > { %v347_v56 = vpop.permute.xlu0 %346 }
  0x82   : > { %v1130_v8 = vpop.permute.xlu1 %336 }
  0x8e   : > { %v317_v50 = vpop.permute.xlu2 %316 }
  0xa4   : > { %v342_v4 = vpop.permute.xlu0 %341 }
  0xa5   : > { %v332_v38 = vpop.permute.xlu1 %331 }
  0xad   : > { %v370_v51 = vpop.f32.mrf.mxu0 }
  0xae   : > { %v410_v52 = vpop.f32.mrf.mxu1  ;;  %v371_v54 = vadd.f32 %v370_v51, %v317_v50 }
  0xaf   : > { %v411_v55 = vadd.f32 %v410_v52, %v317_v50 }
  0xb0   : > { %v876_v57 = vmul.f32 -1.442695, %v371_v54  ;;  %v327_v54 = vpop.permute.xlu0 %326 }
  0xb1   : > { %v877_v58 = vmul.f32 -1.442695, %v411_v55 }
  0xb2   : > { %944 = vpow2.f32 %v876_v57 }
  0xb3   : > { %946 = vpow2.f32 %v877_v58  ;;  %v560_v58 = vld [vmem:[%s1315_s3] sm:$0x1] }
  0xb4   : > { %v382_v59 = vpop.f32.mrf.mxu2 }
  0xb5   : > { %v373_v60 = vpop.f32.mrf.mxu0  ;;  %v383_v34 = vadd.f32 %v382_v59, %v1130_v8 }
  0xb6   : > { %v1121_v61 = vadd.f32 %v373_v60, %v322_v49  ;;  %v413_v62 = vpop.f32.mrf.mxu1  ;;  %v425_v63 = vpop.f32.mrf.mxu3 }
  0xb7   : > { %v1123_v0 = vadd.f32 %v413_v62, %v322_v49  ;;  %v426_v5 = vadd.f32 %v425_v63, %v342_v4  ;;  %v546_v47 = vmul.f32 0.2, %v383_v34  ;;  %vm538_vm5 = vcmp.gt.f32.partialorder %v383_v34, 0.0 }
  0xb8   : > { %v471_v1 = vmul.f32 %v1121_v61, %v1121_v61  ;;  %v945_v7 = vpop.eup %944 }
  0xb9   : > { %v472_v2 = vmul.f32 %v1123_v0, %v1123_v0  ;;  %v947_v12 = vpop.eup %946  ;;  %v549_v18 = vmul.f32 0.2, %v426_v5  ;;  %v1137_v19 = vadd.f32 1.0, %v945_v7  ;;  %vm541_vm1 = vcmp.gt.f32.partialorder %v426_v5, 0.0 }
  0xba   : > { %v474_v3 = vsel %vm473_vm0, %v471_v1, 0.0  ;;  %v1139_v21 = vadd.f32 1.0, %v947_v12 }
  0xbb   : > { %v475_v9 = vrot.slane %v474_v3, 4  ;;  %v481_v10 = vsel %vm473_vm0, %v472_v2, 0.0  ;;  %v557_v27 = vsel %vm541_vm1, %v426_v5, %v549_v18  ;;  %948 = vrcp.f32 %v1137_v19 }
  0xbc   : > { %v385_v6 = vpop.f32.mrf.mxu2  ;;  %v482_v13 = vrot.slane %v481_v10, 4  ;;  %950 = vrcp.f32 %v1139_v21  ;;  %vm446_vm10 = vweird.f32 %v1137_v19  ;;  %v467_v18 = vand.u32 2147483648, %v1139_v21 }
  0xbd   : > { %v1133_v11 = vpop.f32.mrf.mxu0  ;;  %v476_v16 = vadd.f32 %v475_v9, %v474_v3  ;;  %v386_v29 = vadd.f32 %v385_v6, %v342_v4 }
  0xbe   : > { %v1135_v14 = vpop.f32.mrf.mxu1  ;;  %v428_v15 = vpop.f32.mrf.mxu3  ;;  %v483_v20 = vadd.f32 %v482_v13, %v481_v10  ;;  %v377_v59 = vadd.f32 %v1133_v11, %v327_v54 }
  0xbf   : > { %v429_v17 = vadd.f32 %v428_v15, %v347_v56  ;;  %v477_v22 = vrot.slane %v476_v16, 2  ;;  %v548_v42 = vmul.f32 0.2, %v386_v29  ;;  %vm540_vm4 = vcmp.gt.f32.partialorder %v386_v29, 0.0 }
  0xc0   : > { %v484_v24 = vrot.slane %v483_v20, 2  ;;  %v417_v63 = vadd.f32 %v1135_v14, %v327_v54 }
  0xc1   : > { %vm543_vm2 = vcmp.gt.f32.partialorder %v429_v17, 0.0  ;;  %v551_v23 = vmul.f32 0.2, %v429_v17  ;;  %v478_v25 = vadd.f32 %v477_v22, %v476_v16  ;;  %v1146_v44 = vpop.eup %948  ;;  %v556_v49 = vsel %vm540_vm4, %v386_v29, %v548_v42 }
  0xc2   : > { %v485_v28 = vadd.f32 %v484_v24, %v483_v20  ;;  %v1150_v48 = vpop.eup %950  ;;  %v442_v52 = vmul.f32 %v1146_v44, %v1137_v19  ;;  %vm447_vm11 = vweird.f32 %v1146_v44  ;;  %v452_v16 = vand.u32 2147483648, %v1137_v19 }
  0xc3   : > { %v559_v26 = vsel %vm543_vm2, %v429_v17, %v551_v23  ;;  %v479_v31 = vrot.slane %v478_v25, 1  ;;  %v457_v53 = vmul.f32 %v1150_v48, %v1139_v21  ;;  %vm462_vm13 = vweird.f32 %v1150_v48  ;;  %vm1180_vm15 = vmor %vm446_vm10, %vm447_vm11 }
  0xc4   : > { %v388_v30 = vpop.f32.mrf.mxu2  ;;  %604 = vmatpush.msrb.mxu3 %v559_v26  ;;  %v486_v35 = vrot.slane %v485_v28, 1  ;;  %v443_v4 = vsub.f32 1.0, %v442_v52  ;;  %vm461_vm4 = vweird.f32 %v1139_v21  ;;  %vm750_vm10 = vcmask 1042432  }
  0xc5   : > { %v389_v32 = vadd.f32 %v388_v30, %v347_v56  ;;  %v379_v33 = vpop.f32.mrf.mxu0  ;;  %v480_v37 = vadd.f32 %v479_v31, %v478_v25  ;;  %v554_v56 = vsel %vm538_vm5, %v383_v34, %v546_v47  ;;  %v458_v5 = vsub.f32 1.0, %v457_v53 }
  0xc6   : > { %v419_v36 = vpop.f32.mrf.mxu1  ;;  %605 = vmatpush.msrb.mxu3 %v557_v27  ;;  %v487_v39 = vadd.f32 %v486_v35, %v485_v28  ;;  %v380_v40 = vadd.f32 %v379_v33, %v332_v38  ;;  %v444_v12 = vmul.f32 %v1146_v44, %v443_v4  ;;  %v450_v28 = vand.u32 2147483647, %v1137_v19 }
  0xc7   : > { %vm542_vm3 = vcmp.gt.f32.partialorder %v389_v32, 0.0  ;;  %v550_v41 = vmul.f32 0.2, %v389_v32  ;;  %v1144_v43 = vmax.f32 %v480_v37, 1e-24  ;;  %v420_v51 = vadd.f32 %v419_v36, %v332_v38 }
  0xc8   : > { %v1148_v45 = vmax.f32 %v487_v39, 1e-24  ;;  %v544_v50 = vmul.f32 0.2, %v380_v40  ;;  %vm536_vm6 = vcmp.gt.f32.partialorder %v380_v40, 0.0  ;;  %v459_v13 = vmul.f32 %v1150_v48, %v458_v5 }
  0xc9   : > { %v558_v46 = vsel %vm542_vm3, %v389_v32, %v550_v41  ;;  %952 = vrsqrt.f32 %v1144_v43  ;;  %v545_v2 = vmul.f32 0.2, %v420_v51  ;;  %vm537_vm9 = vcmp.gt.f32.partialorder %v420_v51, 0.0 }
  0xca   : > { %584 = vmatpush.msrb.mxu2 %v558_v46  ;;  %954 = vrsqrt.f32 %v1148_v45  ;;  %v552_v60 = vsel %vm536_vm6, %v380_v40, %v544_v50  ;;  %v1178_v23 = vadd.f32 %v1146_v44, %v444_v12  ;;  %v1185_v25 = vadd.f32 %v1150_v48, %v459_v13  ;;  %vm1199_vm6 = vmor %vm461_vm4, %vm462_vm13 }
  0xcb   : > { %956 = vtanh.f32 %v377_v59  ;;  %v553_v11 = vsel %vm537_vm9, %v420_v51, %v545_v2  ;;  %vm496_vm1 = vweird.f32 %v1144_v43  ;;  %vm506_vm3 = vweird.f32 %v1148_v45 }
  0xcc   : > { %585 = vmatpush.msrb.mxu2 %v556_v49  ;;  %958 = vtanh.f32 %v417_v63  ;;  %v1192_v30 = vor.u32 1.1754944e-38, %v452_v16  ;;  %v465_v31 = vand.u32 2147483647, %v1139_v21  ;;  %v1203_v19 = vor.u32 1.1754944e-38, %v467_v18 }
  0xcd   : > { %v449_v21 = vsel %vm1180_vm15, %v1146_v44, %v1178_v23  ;;  %v464_v37 = vsel %vm1199_vm6, %v1150_v48, %v1185_v25  ;;  %vm764_vm9 = vcmask 1040384   ;;  %vm767_vm11 = vcmask 1041408  }
  0xce   : > { %v422_v55 = vpop.f32.mrf.mxu1  ;;  %586 = vmatpush.msrb.mxu2 %v554_v56  ;;  %vm758_vm13 = vcmask 1045504  }
  0xcf   : > { %v423_v57 = vadd.f32 %v422_v55, %v1130_v8  ;;  %v953_v62 = vpop.eup %952 }
  0xd0   : > { %587 = vmatpush.msrb.mxu2 %v552_v60  ;;  %v955_v3 = vpop.eup %954  ;;  %v491_v6 = vmul.f32 %v953_v62, %v1144_v43  ;;  %vm497_vm12 = vweird.f32 %v953_v62 }
  0xd1   : > { %vm539_vm8 = vcmp.gt.f32.partialorder %v423_v57, 0.0  ;;  %v547_v1 = vmul.f32 0.2, %v423_v57  ;;  %878 = vmatmul.msk.f32.vlgmr.msrb.gmra.mxu2 %vm568_vm7, %v560_v58  ;;  %v501_v7 = vmul.f32 %v955_v3, %v1148_v45  ;;  %vm507_vm14 = vweird.f32 %v955_v3  ;;  %v1175_v22 = vpop.eup %956  ;;  %vm498_vm2 = vmor %vm496_vm1, %vm497_vm12 }
  0xd2   : > { %v492_v9 = vmul.f32 %v953_v62, %v491_v6  ;;  %v1188_v27 = vpop.eup %958  ;;  %vm508_vm5 = vmor %vm506_vm3, %vm507_vm14  ;;  %v740_v36 = vrot.slane %v1175_v22, 4  ;;  %vm755_vm12 = vcmask 1044480   ;;  %vm761_vm14 = vcmask 1046528  }
  0xd3   : > { %v555_v8 = vsel %vm539_vm8, %v423_v57, %v547_v1  ;;  %v502_v10 = vmul.f32 %v955_v3, %v501_v7  ;;  %v741_v39 = vrot.slane %v1188_v27, 4  ;;  %vm1221_vm8 = vcmp.eq.f32.partialorder %v465_v31, 8.507059e+37 }
  0xd4   : > { %606 = vmatpush.msrb.mxu3 %v555_v8  ;;  %v493_v14 = vmul.f32 0.5, %v492_v9 }
  0xd5   : > { %v503_v15 = vmul.f32 0.5, %v502_v10 }
  0xd6   : > { %607 = vmatpush.msrb.mxu3 %v553_v11  ;;  %v494_v17 = vsub.f32 1.5, %v493_v14 }
  0xd7   : > { %879 = vmatmul.msk.f32.vlgmr.msrb.gmra.mxu3 %vm568_vm7, %v560_v58  ;;  %v504_v20 = vsub.f32 1.5, %v503_v15  ;;  %vm1217_vm7 = vcmp.eq.f32.partialorder %v450_v28, 8.507059e+37 }
  0xd8   : > { %v495_v26 = vmul.f32 %v953_v62, %v494_v17  ;;  %v454_v31 = vsel %vm1217_vm7, %v1192_v30, %v449_v21 }
  0xd9   : > { %v505_v29 = vmul.f32 %v955_v3, %v504_v20 }
  0xda   : > { %v499_v32 = vsel %vm498_vm2, %v953_v62, %v495_v26 }
  0xdb   : > { %v510_v34 = vmul.f32 %v499_v32, %v1121_v61  ;;  %v509_v35 = vsel %vm508_vm5, %v955_v3, %v505_v29  ;;  %v469_v32 = vsel %vm1221_vm8, %v1203_v19, %v464_v37 }
  0xdc   : > { %v511_v38 = vmul.f32 %v509_v35, %v1123_v0 }
  0xdd   : > { %v512_v40 = vmul.f32 %v510_v34, %v510_v34  ;;  %v516_v41 = vrot.slane %v510_v34, 1  ;;  %v522_v61 = vrot.slane %v510_v34, 2  ;;  %v528_v42 = vrot.slane %v510_v34, 3 }
  0xde   : > { %v513_v43 = vmul.f32 %v511_v38, %v511_v38  ;;  %v517_v45 = vrot.slane %v511_v38, 1  ;;  %v523_v46 = vrot.slane %v511_v38, 2  ;;  %v529_v47 = vrot.slane %v511_v38, 3 }
  0xdf   : > { %v520_v49 = vmul.f32 %v516_v41, %v510_v34  ;;  %v532_v50 = vmul.f32 %v528_v42, %v510_v34  ;;  %v526_v44 = vmul.f32 %v522_v61, %v510_v34  ;;  %v614_v51 = vrot.slane %v512_v40, 1 }
  0xe0   : > { %v521_v48 = vmul.f32 %v517_v45, %v511_v38  ;;  %v533_v53 = vmul.f32 %v529_v47, %v511_v38  ;;  %v527_v54 = vmul.f32 %v523_v46, %v511_v38  ;;  %v615_v55 = vrot.slane %v513_v43, 1 }
  0xe1   : > { %v1225_v56 = vmul.f32 2.0, %v520_v49  ;;  %v1227_v57 = vmul.f32 2.0, %v532_v50  ;;  %v618_v58 = vadd.f32 %v614_v51, %v512_v40  ;;  %v1229_v59 = vrot.slane %v512_v40, 2 }
  0xe2   : > { %v1231_v60 = vmul.f32 2.0, %v521_v48  ;;  %v1233_v62 = vmul.f32 2.0, %v533_v53  ;;  %v619_v63 = vadd.f32 %v615_v55, %v513_v43  ;;  %v1235_v1 = vrot.slane %v513_v43, 2 }
  0xe3   : > { %v624_v2 = vsub.f32 %v618_v58, %v1229_v59  ;;  %v1238_v3 = vrot.slane %v512_v40, 3  ;;  %v1240_v4 = vrot.slane %v513_v43, 3  ;;  %v638_v5 = vrot.slane %v1227_v57, 7 }
  0xe4   : > { %v625_v6 = vsub.f32 %v619_v63, %v1235_v1  ;;  %v639_v7 = vrot.slane %v1233_v62, 7  ;;  %v644_v8 = vmul.f32 2.0, %v526_v44  ;;  %v645_v9 = vmul.f32 2.0, %v527_v54 }
  0xe5   : > { %v630_v10 = vsub.f32 %v624_v2, %v1238_v3  ;;  %v642_v11 = vsub.f32 %v1225_v56, %v638_v5  ;;  %v662_v12 = vsub.f32 %v512_v40, %v614_v51  ;;  %v663_v13 = vsub.f32 %v513_v43, %v615_v55 }
  0xe6   : > { %v631_v14 = vsub.f32 %v625_v6, %v1240_v4  ;;  %v643_v15 = vsub.f32 %v1231_v60, %v639_v7  ;;  %v668_v16 = vrot.slane %v1225_v56, 6  ;;  %v669_v17 = vrot.slane %v1231_v60, 6 }
  0xe7   : > { %v674_v18 = vrot.slane %v644_v8, 7  ;;  %v675_v20 = vrot.slane %v645_v9, 7  ;;  %v680_v23 = vrot.slane %v1225_v56, 2  ;;  %v681_v24 = vrot.slane %v1231_v60, 2 }
  0xe8   : > { %v672_v25 = vsub.f32 %v1225_v56, %v668_v16  ;;  %v673_v26 = vsub.f32 %v1231_v60, %v669_v17  ;;  %v686_v28 = vsub.f32 %v662_v12, %v1229_v59  ;;  %v687_v29 = vsub.f32 %v663_v13, %v1235_v1  ;;  %v391_v16 = vpop.f32.mrf.mxu2  ;;  %v431_v17 = vpop.f32.mrf.mxu3 }
  0xe9   : > { %v684_v33 = vadd.f32 %v680_v23, %v1225_v56  ;;  %v685_v34 = vadd.f32 %v681_v24, %v1231_v60  ;;  %v692_v40 = vrot.slane %v630_v10, 5  ;;  %v693_v41 = vrot.slane %v631_v14, 5 }
  0xea   : > { %v688_v35 = vadd.f32 %v686_v28, %v1238_v3  ;;  %v689_v38 = vadd.f32 %v687_v29, %v1240_v4  ;;  %v678_v61 = vsub.f32 %v644_v8, %v674_v18  ;;  %v679_v42 = vsub.f32 %v645_v9, %v675_v20  ;;  %v565_v18 = vpop.permute.xlu1 %564 }
  0xeb   : > { %v722_v43 = vrot.slane %v672_v25, 2  ;;  %v723_v45 = vrot.slane %v673_v26, 2  ;;  %v698_v30 = vrot.slane %v642_v11, 5  ;;  %v699_v21 = vrot.slane %v643_v15, 5 }
  0xec   : > { %v728_v46 = vrot.slane %v684_v33, 6  ;;  %v729_v19 = vrot.slane %v685_v34, 6  ;;  %v734_v37 = vrot.slane %v688_v35, 5  ;;  %v735_v47 = vrot.slane %v689_v38, 5 }
  0xed   : > { %v765_v49 = vsel %vm764_vm9, %v722_v43, %v678_v61  ;;  %v766_v50 = vsel %vm764_vm9, %v723_v45, %v679_v42  ;;  %v751_v44 = vsel %vm750_vm10, %v454_v31, %v692_v40  ;;  %v752_v51 = vsel %vm750_vm10, %v469_v32, %v693_v41 }
  0xee   : > { %v768_v52 = vsel %vm767_vm11, %v765_v49, %v728_v46  ;;  %v769_v0 = vsel %vm767_vm11, %v766_v50, %v729_v19  ;;  %v648_v54 = vrot.slane %v644_v8, 1  ;;  %v649_v55 = vrot.slane %v645_v9, 1 }
  0xef   : > { %v770_v48 = vsel %vm750_vm10, %v768_v52, %v734_v37  ;;  %v771_v53 = vsel %vm750_vm10, %v769_v0, %v735_v47  ;;  %v656_v2 = vrot.slane %v1225_v56, 1  ;;  %v657_v5 = vrot.slane %v1231_v60, 1 }
  0xf0   : > { %v772_v58 = vsel %vm473_vm0, %v770_v48, %v740_v36  ;;  %v773_v63 = vsel %vm473_vm0, %v771_v53, %v741_v39  ;;  %v652_v6 = vadd.f32 %v648_v54, %v644_v8  ;;  %v653_v7 = vadd.f32 %v649_v55, %v645_v9 }
  0xf1   : > { %v664_v10 = vadd.f32 %v662_v12, %v1229_v59  ;;  %v665_v11 = vadd.f32 %v663_v13, %v1235_v1  ;;  %v753_v14 = vsel %vm473_vm0, %v751_v44, %v698_v30  ;;  %v754_v22 = vsel %vm473_vm0, %v752_v51, %v699_v21 }
  0xf2   : > { %v660_v36 = vadd.f32 %v656_v2, %v1227_v57  ;;  %v661_v27 = vadd.f32 %v657_v5, %v1233_v62  ;;  %v704_v60 = vrot.slane %v652_v6, 3  ;;  %v705_v8 = vrot.slane %v653_v7, 3 }
  0xf3   : > { %v666_v39 = vsub.f32 %v664_v10, %v1238_v3  ;;  %v667_v56 = vsub.f32 %v665_v11, %v1240_v4  ;;  %v567_v20 = vperm.slane %v565_v18, 0 }
  0xf4   : > { %v710_v9 = vrot.slane %v660_v36, 2  ;;  %v711_v15 = vrot.slane %v661_v27, 2  ;;  %v756_v12 = vsel %vm755_vm12, %v753_v14, %v704_v60  ;;  %v757_v57 = vsel %vm755_vm12, %v754_v22, %v705_v8 }
  0xf5   : > { %v716_v59 = vrot.slane %v666_v39, 1  ;;  %v717_v1 = vrot.slane %v667_v56, 1 }
  0xf6   : > { %v759_v62 = vsel %vm758_vm13, %v756_v12, %v710_v9  ;;  %v760_v3 = vsel %vm758_vm13, %v757_v57, %v711_v15 }
  0xf7   : > { %v762_v4 = vsel %vm761_vm14, %v759_v62, %v716_v59  ;;  %v763_v13 = vsel %vm761_vm14, %v760_v3, %v717_v1 }
  0xf8   : > { %776 = vst [vmem:[%s264_s15] sm:$0xff] %v762_v4 }
  0xf9   : > { %777 = vst [vmem:[%s264_s15 + $0x8] sm:$0xff] %v763_v13 }
 0x154   : > { %v589_v23 = vpop.f32.mrf.mxu2 }
 0x155   : > { %v590_v24 = vadd.f32 %v589_v23, %v567_v20 }
 0x157   : > { %v746_v25 = vrot.slane %v590_v24, 1 }
 0x159   : > { %v774_v26 = vsel %vm761_vm14, %v772_v58, %v746_v25 }
 0x15a   : > { %v609_v28 = vpop.f32.mrf.mxu3  ;;  %778 = vst [vmem:[%s264_s15 + $0x10] sm:$0xff] %v774_v26 }
 0x15b   : > { %v610_v29 = vadd.f32 %v609_v28, %v567_v20 }
 0x15d   : > { %v747_v31 = vrot.slane %v610_v29, 1 }
 0x15f   : > { %v775_v32 = vsel %vm761_vm14, %v773_v63, %v747_v31 }
 0x160   : > { %779 = vst [vmem:[%s264_s15 + $0x18] sm:$0xff] %v775_v32 }
 0x161 PF: > { %s17_s22 = sadd.s32 1, %s982_s22   ;;  %s1326_s20 = smov %s978_s21 }
 0x162   : > { %p14_p5 = scmp.ge.s32.totalorder %s17_s22, 4   ;;  %s1327_s21 = smov %s1329_s4 }
 0x164   :  { %16 = sbr.rel (!%p14_p5) target bundleno = 3 (0x3), region = 70 }

</bundles_post_ra>
